<compile_context>
chip_gen: v7x
topology: tpu7x:2x2x1
jax: 0.10.0
libtpu: 0.0.40
codegen_flags: <defaults>
</compile_context>

<pallas_src>
import jax
import jax.numpy as jnp
from jax.experimental import pallas as pl
from jax.experimental.pallas import tpu as pltpu


def _cdiv(a, b):
    return -(-a // b)


def full3net_kernel(xT_ref, w1_ref, b1_ref, w2_ref, b2_ref, w3_ref, b3_ref,
                    o_ref):
    """One batch tile in transposed (feature, batch) layout.

    xT_ref : (2,   TB)  input, batch along lanes (act dtype: f32 or bf16)
    w1_ref : (hid, 2)   b1_ref : (hid, 1)   (act dtype)
    w2_ref : (hid, hid) bf16    b2_ref : (hid, 1) f32
    w3_ref : (hid, 1)   f32     b3_ref : (1, 1)   f32, SMEM scalar
    o_ref  : (1,   TB)  f32 sigmoid output (lane-dense, unmasked store)
    """
    act_dtype = xT_ref.dtype

    x0 = xT_ref[0:1, :]                                   # (1, TB)
    x1 = xT_ref[1:2, :]                                   # (1, TB)

    # layer 1: K=2 wastes the MXU -> VPU broadcast-FMA (bf16 on v6e/v7x)
    s1 = w1_ref[:, 0:1] * x0 + w1_ref[:, 1:2] * x1 + b1_ref[...]   # (hid, TB)
    h1 = jnp.tanh(s1)                                     # EUP, lane-dense

    # layer 2: the only MXU matmul; bf16 operands, f32 accumulation, f32 bias
    s2 = jnp.dot(w2_ref[...], h1.astype(jnp.bfloat16),
                 preferred_element_type=jnp.float32) + b2_ref[...]  # (hid, TB)
    h2 = jnp.tanh(s2.astype(act_dtype))                   # bf16 EUP on v6e/v7x

    # layer 3: N=1 wastes the MXU -> VPU multiply + sublane (XLU) reduce in f32
    s3 = jnp.sum(h2 * w3_ref[...], axis=0, keepdims=True) + b3_ref[0, 0]
    o_ref[...] = jax.nn.sigmoid(s3).astype(o_ref.dtype)


def _default_act_dtype():
    """bf16 elementwise/EUP path on v6e/v7x; keep f32 on v5e/v4 (no bf16 VPU/EUP)."""
    try:
        kind = jax.devices()[0].device_kind.lower()
    except Exception:
        return jnp.float32
    if ("v6" in kind) or ("v7" in kind) or ("7x" in kind):
        return jnp.bfloat16
    return jnp.float32


def full3net_forward(x, params, *, tb=16384, act_dtype=None,
                     vmem_limit_bytes=40 * 1024 * 1024):
    """x: (B, 2) float32.  params in PyTorch nn.Linear layout:
       w1 (hid,2), b1 (hid,), w2 (hid,hid), b2 (hid,), w3 (1,hid), b3 (1,)."""
    if act_dtype is None:
        act_dtype = _default_act_dtype()

    # Weights hoisted to their in-kernel dtypes once (constant across grid
    # steps, VMEM-resident via constant index_maps below).
    w1 = params["w1"].astype(act_dtype)                      # (hid, 2)
    b1 = params["b1"].reshape(-1, 1).astype(act_dtype)       # (hid, 1)
    w2 = params["w2"].astype(jnp.bfloat16)                   # (hid, hid) MXU operand
    b2 = params["b2"].reshape(-1, 1).astype(jnp.float32)     # (hid, 1)
    w3 = params["w3"].reshape(1, -1).T.astype(jnp.float32)   # (hid, 1)
    b3 = params["b3"].reshape(1, 1).astype(jnp.float32)      # (1, 1) -> SMEM

    B = x.shape[0]
    lane = 128
    tb = _cdiv(max(tb, lane), lane) * lane
    # Don't over-pad tiny batches; large B keeps the full (default 16K-lane)
    # tile so the ~0.35 us per-grid-step overhead is amortized.
    tb = min(tb, _cdiv(B, lane) * lane)
    B_pad = _cdiv(B, tb) * tb
    n_tiles = B_pad // tb

    # Transposed, lane-padded input (2, B_pad): fusable pad of x.T, no scatter
    # into a fresh zero buffer.  Padded lanes compute bias-only garbage that is
    # sliced off before returning.
    xT = x.astype(act_dtype).T
    if B_pad != B:
        xT = jnp.pad(xT, ((0, 0), (0, B_pad - B)))

    const = lambda shape: pl.BlockSpec(shape, lambda i: (0, 0))

    out_flat = pl.pallas_call(
        full3net_kernel,
        out_shape=jax.ShapeDtypeStruct((1, B_pad), jnp.float32),
        grid=(n_tiles,),
        in_specs=[
            pl.BlockSpec((2, tb), lambda i: (0, i)),   # per-step input tile
            const(w1.shape), const(b1.shape),          # weights stay VMEM-resident
            const(w2.shape), const(b2.shape),
            const(w3.shape),
            pl.BlockSpec(memory_space=pltpu.MemorySpace.SMEM),   # (1,1) scalar b3
        ],
        out_specs=pl.BlockSpec((1, tb), lambda i: (0, i)),   # lane-dense output slab
        compiler_params=pltpu.CompilerParams(
            # TODO(synk): on v7x confirm the batch axis is actually sharded
            # across both TensorCores; if not, switch to pltpu.CORE_PARALLEL.
            dimension_semantics=("parallel",),
            vmem_limit_bytes=vmem_limit_bytes,
        ),
    )(xT, w1, b1, w2, b2, w3, b3)

    return out_flat[0, :B].reshape(B, 1)


def init_params(key, hid=32):
    """Deterministic init mimicking PyTorch nn.Linear default:
    U(-1/sqrt(fan_in), 1/sqrt(fan_in)); weights stored (out, in) like PyTorch."""
    def linear(k, fan_in, fan_out):
        kw, kb = jax.random.split(k)
        bound = 1.0 / jnp.sqrt(jnp.float32(fan_in))
        w = jax.random.uniform(kw, (fan_out, fan_in), jnp.float32, -bound, bound)
        b = jax.random.uniform(kb, (fan_out,), jnp.float32, -bound, bound)
        return w, b

    k1, k2, k3 = jax.random.split(key, 3)
    w1, b1 = linear(k1, 2, hid)
    w2, b2 = linear(k2, hid, hid)
    w3, b3 = linear(k3, hid, 1)
    return {"w1": w1, "b1": b1, "w2": w2, "b2": b2, "w3": w3, "b3": b3}


def _mm(a, b):
    # Force true-f32 matmul precision so references don't silently drop to bf16.
    return jnp.dot(a, b, precision=jax.lax.Precision.HIGHEST)


def full3net_reference(x, p):
    """Pure f32 reference matching the PyTorch module exactly."""
    h1 = jnp.tanh(_mm(x, p["w1"].T) + p["b1"])
    h2 = jnp.tanh(_mm(h1, p["w2"].T) + p["b2"])
    return jax.nn.sigmoid(_mm(h2, p["w3"].T) + p["b3"])


def full3net_reference_matched(x, p, act_dtype):
    """Reference mirroring the kernel's mixed-precision choices:
    act_dtype layer-1/elementwise, bf16 layer-2 MXU operands, f32 accumulation."""
    xa = x.astype(act_dtype)
    w1 = p["w1"].astype(act_dtype)
    b1 = p["b1"].astype(act_dtype)
    s1 = (xa[:, 0:1] * w1[:, 0].reshape(1, -1)
          + xa[:, 1:2] * w1[:, 1].reshape(1, -1) + b1)
    h1 = jnp.tanh(s1)
    s2 = jnp.dot(h1.astype(jnp.bfloat16), p["w2"].T.astype(jnp.bfloat16),
                 preferred_element_type=jnp.float32) + p["b2"]
    h2 = jnp.tanh(s2.astype(act_dtype)).astype(jnp.float32)
    s3 = _mm(h2, p["w3"].T.astype(jnp.float32)) + p["b3"]
    return jax.nn.sigmoid(s3)


if __name__ == "__main__":
    key = jax.random.PRNGKey(0)
    kx, kp = jax.random.split(key)

    batch, hid = 8, 32
    x = jax.random.normal(kx, (batch, 2), jnp.float32)
    params = init_params(kp, hid=hid)

    act_dtype = _default_act_dtype()
    out = jax.block_until_ready(full3net_forward(x, params, act_dtype=act_dtype))
    assert out.shape == (batch, 1)

    # Check against a reference with matching mixed-precision choices.
    ref_matched = full3net_reference_matched(x, params, act_dtype)
    tol = 2e-4 if jnp.dtype(act_dtype) == jnp.dtype(jnp.float32) else 1e-2
    assert jnp.allclose(out, ref_matched, atol=tol, rtol=tol), \
        "mismatch vs matched-precision reference"

    # Loose check against the exact f32 module semantics (bf16 MXU/EUP budget).
    ref_f32 = full3net_reference(x, params)
    assert jnp.allclose(out, ref_f32, atol=2e-2, rtol=0.0), \
        "mismatch vs f32 reference"

    print("KERNEL_OK")
</pallas_src>

<mosaic_0001>
module attributes {stable_mosaic.version = 11 : i64} {
  func.func @full3net_kernel(%arg0: i32, %arg1: memref<2x128xf32, #tpu.memory_space<vmem>>, %arg2: memref<32x2xf32, #tpu.memory_space<vmem>>, %arg3: memref<32x1xf32, #tpu.memory_space<vmem>>, %arg4: memref<32x32xbf16, #tpu.memory_space<vmem>>, %arg5: memref<32x1xf32, #tpu.memory_space<vmem>>, %arg6: memref<32x1xf32, #tpu.memory_space<vmem>>, %arg7: memref<1x1xf32, #tpu.memory_space<smem>>, %arg8: memref<1x128xf32, #tpu.memory_space<vmem>>) attributes {dimension_semantics = [#tpu.dimension_semantics<parallel>], iteration_bounds = array<i64: 1>, scalar_prefetch = 0 : i64, scratch_operands = 0 : i64, tpu.core_type = #tpu.core_type<tc>, window_params = [{transform_indices = @transform_0, window_bounds = array<i64: 2, 128>}, {pipeline_mode = #tpu.pipeline_mode<synchronous>, transform_indices = @transform_1, window_bounds = array<i64: 32, 2>}, {pipeline_mode = #tpu.pipeline_mode<synchronous>, transform_indices = @transform_2, window_bounds = array<i64: 32, 1>}, {pipeline_mode = #tpu.pipeline_mode<synchronous>, transform_indices = @transform_3, window_bounds = array<i64: 32, 32>}, {pipeline_mode = #tpu.pipeline_mode<synchronous>, transform_indices = @transform_4, window_bounds = array<i64: 32, 1>}, {pipeline_mode = #tpu.pipeline_mode<synchronous>, transform_indices = @transform_5, window_bounds = array<i64: 32, 1>}, {transform_indices = @transform_6, window_bounds = array<i64: 1, 1>}, {transform_indices = @transform_7, window_bounds = array<i64: 1, 128>}]} {
    %c0 = arith.constant 0 : index
    %c0_0 = arith.constant 0 : index
    %0 = vector.load %arg1[%c0, %c0_0] : memref<2x128xf32, #tpu.memory_space<vmem>>, vector<1x128xf32>
    %c1 = arith.constant 1 : index
    %c0_1 = arith.constant 0 : index
    %1 = vector.load %arg1[%c1, %c0_1] : memref<2x128xf32, #tpu.memory_space<vmem>>, vector<1x128xf32>
    %c0_2 = arith.constant 0 : index
    %c0_3 = arith.constant 0 : index
    %2 = vector.load %arg2[%c0_2, %c0_3] : memref<32x2xf32, #tpu.memory_space<vmem>>, vector<32x1xf32>
    %3 = vector.broadcast %2 : vector<32x1xf32> to vector<32x128xf32>
    %4 = vector.broadcast %0 : vector<1x128xf32> to vector<32x128xf32>
    %5 = arith.mulf %3, %4 : vector<32x128xf32>
    %c0_4 = arith.constant 0 : index
    %c1_5 = arith.constant 1 : index
    %6 = vector.load %arg2[%c0_4, %c1_5] : memref<32x2xf32, #tpu.memory_space<vmem>>, vector<32x1xf32>
    %7 = vector.broadcast %6 : vector<32x1xf32> to vector<32x128xf32>
    %8 = vector.broadcast %1 : vector<1x128xf32> to vector<32x128xf32>
    %9 = arith.mulf %7, %8 : vector<32x128xf32>
    %10 = arith.addf %5, %9 : vector<32x128xf32>
    %c0_6 = arith.constant 0 : index
    %c0_7 = arith.constant 0 : index
    %11 = vector.load %arg3[%c0_6, %c0_7] : memref<32x1xf32, #tpu.memory_space<vmem>>, vector<32x1xf32>
    %12 = vector.broadcast %11 : vector<32x1xf32> to vector<32x128xf32>
    %13 = arith.addf %10, %12 : vector<32x128xf32>
    %14 = math.tanh %13 : vector<32x128xf32>
    %c0_8 = arith.constant 0 : index
    %c0_9 = arith.constant 0 : index
    %15 = vector.load %arg4[%c0_8, %c0_9] : memref<32x32xbf16, #tpu.memory_space<vmem>>, vector<32x32xbf16>
    %16 = arith.truncf %14 : vector<32x128xf32> to vector<32x128xbf16>
    %cst = arith.constant dense<0.000000e+00> : vector<32x128xf32>
    %17 = tpu.matmul %15, %16, %cst {dimension_numbers = #tpu.dot_dimension_numbers<[1], [0], [0], [1], [0, 0, 1, 1], [], []>} : vector<32x32xbf16>, vector<32x128xbf16>, vector<32x128xf32> -> vector<32x128xf32>
    %c0_10 = arith.constant 0 : index
    %c0_11 = arith.constant 0 : index
    %18 = vector.load %arg5[%c0_10, %c0_11] : memref<32x1xf32, #tpu.memory_space<vmem>>, vector<32x1xf32>
    %19 = vector.broadcast %18 : vector<32x1xf32> to vector<32x128xf32>
    %20 = arith.addf %17, %19 : vector<32x128xf32>
    %21 = math.tanh %20 : vector<32x128xf32>
    %c0_12 = arith.constant 0 : index
    %c0_13 = arith.constant 0 : index
    %22 = vector.load %arg6[%c0_12, %c0_13] : memref<32x1xf32, #tpu.memory_space<vmem>>, vector<32x1xf32>
    %23 = vector.broadcast %22 : vector<32x1xf32> to vector<32x128xf32>
    %24 = arith.mulf %21, %23 : vector<32x128xf32>
    %cst_14 = arith.constant dense<0.000000e+00> : vector<128xf32>
    %25 = vector.multi_reduction <add>, %24, %cst_14 [0] : vector<32x128xf32> to vector<128xf32>
    %26 = vector.shape_cast %25 : vector<128xf32> to vector<1x128xf32>
    %c0_15 = arith.constant 0 : index
    %c0_16 = arith.constant 0 : index
    %27 = memref.load %arg7[%c0_15, %c0_16] : memref<1x1xf32, #tpu.memory_space<smem>>
    %28 = vector.broadcast %27 : f32 to vector<1x128xf32>
    %29 = arith.addf %26, %28 : vector<1x128xf32>
    %30 = arith.negf %29 : vector<1x128xf32>
    %31 = math.exp %30 : vector<1x128xf32>
    %cst_17 = arith.constant 1.000000e+00 : f32
    %32 = vector.broadcast %cst_17 : f32 to vector<1x128xf32>
    %33 = arith.addf %32, %31 : vector<1x128xf32>
    %34 = arith.divf %32, %33 : vector<1x128xf32>
    %c0_18 = arith.constant 0 : index
    %c0_19 = arith.constant 0 : index
    %35 = vector.load %arg8[%c0_18, %c0_19] : memref<1x128xf32, #tpu.memory_space<vmem>>, vector<1x128xf32>
    tpu.vector_store %arg8[%c0_18, %c0_19], %34 {strides = array<i32>} : memref<1x128xf32, #tpu.memory_space<vmem>>, vector<1x128xf32>,
    return
  }
  func.func @transform_0(%arg0: i32) -> (i32, i32) {
    %c0_i32 = arith.constant 0 : i32
    %c0_i32_0 = arith.constant 0 : i32
    return %c0_i32, %arg0 : i32, i32
  }
  func.func @transform_1(%arg0: i32) -> (i32, i32) {
    %c0_i32 = arith.constant 0 : i32
    %c0_i32_0 = arith.constant 0 : i32
    %c0_i32_1 = arith.constant 0 : i32
    return %c0_i32, %c0_i32_0 : i32, i32
  }
  func.func @transform_2(%arg0: i32) -> (i32, i32) {
    %c0_i32 = arith.constant 0 : i32
    %c0_i32_0 = arith.constant 0 : i32
    %c0_i32_1 = arith.constant 0 : i32
    return %c0_i32, %c0_i32_0 : i32, i32
  }
  func.func @transform_3(%arg0: i32) -> (i32, i32) {
    %c0_i32 = arith.constant 0 : i32
    %c0_i32_0 = arith.constant 0 : i32
    %c0_i32_1 = arith.constant 0 : i32
    return %c0_i32, %c0_i32_0 : i32, i32
  }
  func.func @transform_4(%arg0: i32) -> (i32, i32) {
    %c0_i32 = arith.constant 0 : i32
    %c0_i32_0 = arith.constant 0 : i32
    %c0_i32_1 = arith.constant 0 : i32
    return %c0_i32, %c0_i32_0 : i32, i32
  }
  func.func @transform_5(%arg0: i32) -> (i32, i32) {
    %c0_i32 = arith.constant 0 : i32
    %c0_i32_0 = arith.constant 0 : i32
    %c0_i32_1 = arith.constant 0 : i32
    return %c0_i32, %c0_i32_0 : i32, i32
  }
  func.func @transform_6(%arg0: i32) -> (i32, i32) {
    %c0_i32 = arith.constant 0 : i32
    %c0_i32_0 = arith.constant 0 : i32
    %c0_i32_1 = arith.constant 0 : i32
    return %c0_i32, %c0_i32_0 : i32, i32
  }
  func.func @transform_7(%arg0: i32) -> (i32, i32) {
    %c0_i32 = arith.constant 0 : i32
    %c0_i32_0 = arith.constant 0 : i32
    return %c0_i32, %arg0 : i32, i32
  }
}

</mosaic_0001>

<bundles_post_ra>
// kernel: tpu_custom_call.1
= control target key start
LH: loop header
LB: loop body
LE: loop exit
PB: predicated region body
PF: predicated region fallthrough
CT: control target
= control target key end

     0   :  { %v358_v2 = vmov 1   ;;  %v359_v4 = vmov 0   ;;  %s478_s0 = inlined_call_operand.vmem [shape: f32[2,128], index: 0, kind: input, shape index: {}]   ;;  %s479_s1 = inlined_call_operand.vmem [shape: f32[32,2], index: 1, kind: input, shape index: {}]   ;;  %s480_s2 = inlined_call_operand.vmem [shape: f32[32,1], index: 2, kind: input, shape index: {}]   ;;  %s481_s3 = inlined_call_operand.vmem [shape: bf16[32,32], index: 3, kind: input, shape index: {}]   ;;  %s482_s4 = inlined_call_operand.vmem [shape: f32[32,1], index: 4, kind: input, shape index: {}]   ;;  %s483_s5 = inlined_call_operand.vmem [shape: f32[32,1], index: 5, kind: input, shape index: {}]   ;;  %s484_s6 = inlined_call_operand.<no memory space> [shape: f32[1,1], index: 6, kind: input, shape index: {}]   ;;  %s485_s7 = inlined_call_operand.hbm [shape: f32[1,128], index: 7, kind: output, shape index: {}]  }
   0x1   :  { %v33_v0 = vld [vmem:[%s479_s1 + $0x10] sm:$0xff]  ;;  %v31_v1 = vld [vmem:[%s479_s1] sm:$0xff]  ;;  %308 = vset.pattern.permute.xlu0 %v358_v2  ;;  %306 = vset.pattern.permute.xlu1 %v358_v2  ;;  %v32_v3 = vld [vmem:[%s479_s1 + $0x8] sm:$0xff] }
   0x2   :  { %72 = vperm.xlu0 %308, %v33_v0   ;;  %64 = vperm.xlu1 %306, %v31_v1  }
   0x6   :  { %309 = vset.pattern.permute.xlu0 %v359_v4  ;;  %68 = vperm.xlu1 %306, %v32_v3  }
   0x7   :  { %37 = vperm.xlu0 %309, %v31_v1  }
   0x8   :  { %13 = vsyncpa [#allocation4], 0  ;;  %v34_v5 = vld [vmem:[%s479_s1 + $0x18] sm:$0xff]  ;;  %v92_v6 = vld [vmem:[%s480_s2 + $0x8] sm:$0xff]  ;;  %vm163_vm0 = vcmask 261120   ;;  %s360_s14 = smov [#allocation3]  }
   0x9   :  { %v91_v7 = vld [vmem:[%s480_s2] sm:$0xff]  ;;  %v93_v9 = vld [vmem:[%s480_s2 + $0x10] sm:$0xff]  ;;  %v94_v11 = vld [vmem:[%s480_s2 + $0x18] sm:$0xff]  ;;  %s276_s1 = sshll.u32 %s360_s14, 4  ;;  %s277_s1 = int_to_ptr.vmem [resolvable:$true] %s276_s1 }
   0xa   :  { %307 = vset.pattern.permute.xlu1 %v359_v4  ;;  %v129_v8 = vld [vmem:[%s482_s4] sm:$0xff]  ;;  %v131_v10 = vld [vmem:[%s482_s4 + $0x10] sm:$0xff]  ;;  %v130_v13 = vld [vmem:[%s482_s4 + $0x8] sm:$0xff]  ;;  %s334_s15 = scalar_lea.vmem %s277_s1, 16  ;;  %s338_s16 = scalar_lea.vmem %s277_s1, 32 }
   0xb   :  { %42 = vperm.xlu0 %309, %v32_v3   ;;  %52 = vperm.xlu1 %307, %v34_v5   ;;  %v223_v12 = vld [vmem:[%s483_s5] sm:$0xff]  ;;  %v225_v14 = vld [vmem:[%s483_s5 + $0x10] sm:$0xff]  ;;  %v132_v15 = vld [vmem:[%s482_s4 + $0x18] sm:$0xff]  ;;  %p335_p0 = scmp.ne.s32.totalorder %s277_s1, %s334_s15  ;;  %p339_p1 = scmp.lt.s32.totalorder %s277_s1, %s277_s1 }
   0xc   :  { %v224_v16 = vld [vmem:[%s483_s5 + $0x8] sm:$0xff]  ;;  %v226_v17 = vld [vmem:[%s483_s5 + $0x18] sm:$0xff]  ;;  %v312_v18 = vld [vmem:[%s481_s3] sm:$0xff]   ;;  %p340_p2 = scmp.lt.s32.totalorder %s338_s16, %s334_s15 }
   0xd   :  { %299 = vmatprep.mubr.msk.bf16.mxu0 %vm163_vm0, %v312_v18  ;;  %v284_v25 = vld [vmem:[%s478_s0] ss:$0 sm:$0xff]  ;;  %v285_v27 = vld [vmem:[%s478_s0 + $0x1] ss:$0 sm:$0xff]  ;;  %v313_v55 = vld [vmem:[%s481_s3 + $0x8] sm:$0xff]  }
   0xe   :  { %p341_p3 = por %p340_p2, %p339_p1 }
   0xf   :  { %47 = vperm.xlu0 %309, %v33_v0   ;;  %310 = vset.pattern.permute.xlu1 %v358_v2 }
  0x10   :  { %76 = vperm.xlu1 %310, %v34_v5   ;;  %p342_p4 = pnand %p341_p3, %p335_p0 }
  0x13   :  { %102 = vperm.xlu0 %309, %v92_v6  }
  0x14   :  { %311 = vset.pattern.permute.xlu1 %v359_v4 }
  0x15   :  { %97 = vperm.xlu1 %311, %v91_v7  }
  0x17   :  { %135 = vperm.xlu0 %309, %v129_v8  }
  0x19   :  { %107 = vperm.xlu1 %311, %v93_v9  }
  0x1b   :  { %145 = vperm.xlu0 %309, %v131_v10  }
  0x1d   :  { %112 = vperm.xlu1 %311, %v94_v11  }
  0x1f   :  { %229 = vperm.xlu0 %309, %v223_v12  }
  0x21   :  { %140 = vperm.xlu1 %311, %v130_v13  }
  0x23   :  { %239 = vperm.xlu0 %309, %v225_v14  }
  0x25   :  { %150 = vperm.xlu1 %311, %v132_v15  }
  0x29   :  { %234 = vperm.xlu1 %311, %v224_v16  }
  0x2d   :  { %244 = vperm.xlu1 %311, %v226_v17  }
  0x81   :  { %v65_v19 = vpop.permute.xlu1 %64  ;;  %v73_v20 = vpop.permute.xlu0 %72 }
  0x82   :  { %v83_v32 = vmul.f32 %v285_v27, %v65_v19  ;;  %v85_v40 = vmul.f32 %v285_v27, %v73_v20 }
  0x85   :  { %v69_v21 = vpop.permute.xlu1 %68 }
  0x86   :  { %v38_v22 = vpop.permute.xlu0 %37  ;;  %v84_v29 = vmul.f32 %v285_v27, %v69_v21 }
  0x87   :  { %v59_v30 = vmul.f32 %v284_v25, %v38_v22 }
  0x89   :  { %v87_v36 = vadd.f32 %v83_v32, %v59_v30 }
  0x8a   :  { %v43_v23 = vpop.permute.xlu0 %42  ;;  %v53_v24 = vpop.permute.xlu1 %52 }
  0x8b   :  { %v60_v26 = vmul.f32 %v284_v25, %v43_v23  ;;  %v62_v44 = vmul.f32 %v284_v25, %v53_v24  ;;  %v261_v24 = vstv %s484_s6 }
  0x8d   :  { %v88_v33 = vadd.f32 %v84_v29, %v60_v26 }
  0x8e   :  { %v48_v28 = vpop.permute.xlu0 %47 }
  0x8f   :  { %v77_v31 = vpop.permute.xlu1 %76  ;;  %v61_v37 = vmul.f32 %v284_v25, %v48_v28 }
  0x90   :  { %v86_v41 = vmul.f32 %v285_v27, %v77_v31 }
  0x91   :  { %v89_v43 = vadd.f32 %v85_v40, %v61_v37 }
  0x92   :  { %v103_v34 = vpop.permute.xlu0 %102  ;;  %v90_v46 = vadd.f32 %v86_v41, %v62_v44 }
  0x93   :  { %v116_v35 = vadd.f32 %v103_v34, %v88_v33 }
  0x94   :  { %v98_v38 = vpop.permute.xlu1 %97 }
  0x95   :  { %v115_v39 = vadd.f32 %v98_v38, %v87_v36  ;;  %314 = vtanh.f32 %v116_v35 }
  0x96   :  { %v136_v56 = vpop.permute.xlu0 %135 }
  0x97   :  { %316 = vtanh.f32 %v115_v39 }
  0x98   :  { %v108_v42 = vpop.permute.xlu1 %107 }
  0x99   :  { %v117_v45 = vadd.f32 %v108_v42, %v89_v43 }
  0x9a   :  { %v146_v58 = vpop.permute.xlu0 %145 }
  0x9b   :  { %318 = vtanh.f32 %v117_v45 }
  0x9c   :  { %v113_v47 = vpop.permute.xlu1 %112 }
  0x9d   :  { %v118_v48 = vadd.f32 %v113_v47, %v90_v46 }
  0x9e   :  { %v230_v4 = vpop.permute.xlu0 %229 }
  0x9f   :  { %320 = vtanh.f32 %v118_v48  ;;  %v315_v49 = vpop.eup %314 }
  0xa0   :  { %v141_v57 = vpop.permute.xlu1 %140 }
  0xa1   :  { %v317_v50 = vpop.eup %316 }
  0xa2   :  { %v127_v51 = vpack.c.bf16 %v315_v49, %v317_v50  ;;  %v240_v12 = vpop.permute.xlu0 %239 }
  0xa4   :  { %295 = vmatprep.subr.bf16.mxu0 %v127_v51  ;;  %v151_v0 = vpop.permute.xlu1 %150 }
  0xa5   :  { %296 = vmatpush3.bf16.msra.mxu0 %v127_v51  ;;  %v319_v52 = vpop.eup %318 }
  0xa8   :  { %v235_v6 = vpop.permute.xlu1 %234 }
  0xa9   :  { %v321_v53 = vpop.eup %320 }
  0xaa   :  { %v128_v54 = vpack.c.bf16 %v321_v53, %v319_v52 }
  0xac   :  { %297 = vmatprep.subr.bf16.mxu0 %v128_v54  ;;  %v245_v15 = vpop.permute.xlu1 %244 }
  0xad   :  { %298 = vmatpush3.bf16.msra.mxu0 %v128_v54 }
  0xb0   :  { %300 = vmatmul.mubr.msk.bf16.vlgmr.msra.gmra.mrb[0].mxu0 %vm163_vm0, %v313_v55 }
 0x183   :  { %v301_v59 = vpop.f32.mrb[0].mxu0 }
 0x184   :  { %v213_v60 = vadd.f32 %v301_v59, %v146_v58  ;;  %v204_v61 = vpop.f32.mrb[1].mxu0 }
 0x185   :  { %v205_v62 = vadd.f32 %v204_v61, %v136_v56  ;;  %v302_v63 = vpop.f32.mrb[2].mxu0 }
 0x186   :  { %v207_v1 = vpop.f32.mrb[3].mxu0  ;;  %v216_v2 = vadd.f32 %v302_v63, %v151_v0 }
 0x187   :  { %322 = vtanh.f32 %v205_v62  ;;  %v208_v3 = vadd.f32 %v207_v1, %v141_v57 }
 0x188   :  { %324 = vtanh.f32 %v213_v60 }
 0x189   :  { %326 = vtanh.f32 %v208_v3 }
 0x18a   :  { %328 = vtanh.f32 %v216_v2 }
 0x191   :  { %v323_v5 = vpop.eup %322 }
 0x192   :  { %v325_v7 = vpop.eup %324  ;;  %v247_v9 = vmul.f32 %v323_v5, %v230_v4 }
 0x193   :  { %v327_v8 = vpop.eup %326  ;;  %v249_v13 = vmul.f32 %v325_v7, %v240_v12 }
 0x194   :  { %v248_v10 = vmul.f32 %v327_v8, %v235_v6  ;;  %v329_v11 = vpop.eup %328 }
 0x195   :  { %v250_v16 = vmul.f32 %v329_v11, %v245_v15 }
 0x196   :  { %v251_v14 = vadd.f32 %v248_v10, %v247_v9 }
 0x198   :  { %v252_v17 = vadd.f32 %v251_v14, %v249_v13 }
 0x19a   :  { %v253_v18 = vadd.f32 %v252_v17, %v250_v16 }
 0x19c   :  { %v254_v19 = vrot.slane %v253_v18, 4 }
 0x19e   :  { %v255_v20 = vadd.f32 %v254_v19, %v253_v18 }
 0x1a0   :  { %v256_v21 = vrot.slane %v255_v20, 2 }
 0x1a2   :  { %v257_v22 = vadd.f32 %v256_v21, %v255_v20 }
 0x1a4   :  { %v258_v23 = vrot.slane %v257_v22, 1 }
 0x1a6   :  { %v259_v25 = vadd.f32 %v258_v23, %v257_v22 }
 0x1a8   :  { %v262_v26 = vadd.f32 %v261_v24, %v259_v25 }
 0x1aa   :  { %v290_v27 = vmul.f32 -1.442695, %v262_v26 }
 0x1ac   :  { %330 = vpow2.f32 %v290_v27 }
 0x1b6   :  { %v331_v28 = vpop.eup %330 }
 0x1b7   :  { %v266_v29 = vadd.f32 1.0, %v331_v28 }
 0x1b9   :  { %332 = vrcp.f32 %v266_v29 }
 0x1c3   :  { %v333_v30 = vpop.eup %332 }
 0x1c4   :  { %269 = vst [vmem:[#allocation3] sm:$0x1] %v333_v30 }
 0x1c5   :  { %345 = shalt.err (!%p342_p4)
}
 0x1c6   :  { %s346_s18 = scalar_lea.hbm %s485_s7, 16 }
 0x1c7   :  { %p347_p5 = scmp.ne.s32.totalorder %s485_s7, %s346_s18  ;;  %p350_p6 = scmp.lt.u32.totalorder %s346_s18, %s485_s7 }
 0x1c9   :  { %p352_p7 = pnand %p350_p6, %p347_p5 }
 0x1cb   :  { %355 = shalt.err (!%p352_p7)
}
 0x1cc   :  { %279 = dma.vmem_to_hbm [thread:$0]  %s277_s1, 16, %s485_s7, [#allocation4]  }
 0x1cd   :  { %356 = dma.done.wait [#allocation4], 16  }
 0x1ce   :  { %357 = vsyncadd [#allocation4], 4294967280 }
 0x1cf   :  { %283 = vsyncpa [#allocation4], 1 }

</bundles_post_ra>
